<compile_context>
chip_gen: v6e
topology: v6e:2x2x1
jax: 0.10.0
libtpu: 0.0.40
codegen_flags: <defaults>
</compile_context>

<pallas_src>
import jax
import jax.numpy as jnp
from jax.experimental import pallas as pl
from jax.experimental.pallas import tpu as pltpu


def _conv1x1_kernel(x_ref, w_ref, b_ref, o_ref):
    # x_ref: (M, Cin) f32, w_ref: (Cin, Cout) bf16, b_ref: (1, Cout) f32,
    # o_ref: (M, Cout) f32.
    # Round only x (tiny) to bf16; the weight goes to the MXU as-is in bf16.
    x_bf16 = x_ref[...].astype(jnp.bfloat16)
    acc = jnp.dot(x_bf16, w_ref[...], preferred_element_type=jnp.float32)
    o_ref[...] = (acc + b_ref[...]).astype(o_ref.dtype)


def prepare_conv1x1_weight(weight, dtype=jnp.bfloat16):
    """One-time (outside the hot path) weight preparation.

    weight: (Cout, Cin, 1, 1) PyTorch Conv2d layout, f32.
    returns (Cin, Cout) in `dtype`, ready for x2d @ w.
    """
    Cout, Cin = weight.shape[0], weight.shape[1]
    return weight.reshape(Cout, Cin).T.astype(dtype)


def conv2d_1x1(x_nchw, w_cin_cout, bias):
    """1x1 conv, stride 1, with bias.

    x_nchw:     (N, Cin, H, W) f32
    w_cin_cout: (Cin, Cout)    -- output of prepare_conv1x1_weight (bf16)
    bias:       (Cout,) f32
    returns     (N, Cout, H, W) f32
    """
    N, Cin, H, W = x_nchw.shape
    Cout = w_cin_cout.shape[1]
    M = N * H * W

    # NCHW -> NHWC -> (M, Cin). For H = W = 1 this is just a reshape (free).
    x2d = jnp.transpose(x_nchw, (0, 2, 3, 1)).reshape(M, Cin)
    b2d = bias.reshape(1, Cout).astype(jnp.float32)

    w_bytes = Cin * Cout * jnp.dtype(w_cin_cout.dtype).itemsize
    cost = pl.CostEstimate(
        flops=2 * M * Cin * Cout,
        transcendentals=0,
        bytes_accessed=M * Cin * 4 + w_bytes + Cout * 4 + M * Cout * 4,
    )

    vmem = lambda: pl.BlockSpec(memory_space=pltpu.MemorySpace.VMEM)
    out2d = pl.pallas_call(
        _conv1x1_kernel,
        out_shape=jax.ShapeDtypeStruct((M, Cout), jnp.float32),
        in_specs=[vmem(), vmem(), vmem()],
        out_specs=vmem(),
        cost_estimate=cost,
    )(x2d, w_cin_cout, b2d)

    # (M, Cout) -> (N, H, W, Cout) -> NCHW (free reshapes for H = W = 1).
    return jnp.transpose(out2d.reshape(N, H, W, Cout), (0, 3, 1, 2))


if __name__ == "__main__":
    key = jax.random.PRNGKey(0)
    k_x, k_w, k_b = jax.random.split(key, 3)

    # Shapes implied by the module: input [1, 1536, 1, 1], conv 1536 -> 64.
    N, Cin, H, W = 1, 1536, 1, 1
    Cout = 64

    x = jax.random.normal(k_x, (N, Cin, H, W), dtype=jnp.float32)
    # Deterministic synthetic parameters (not a checkpoint load).
    w = jax.random.normal(k_w, (Cout, Cin, 1, 1), dtype=jnp.float32) * 0.02
    b = jax.random.normal(k_b, (Cout,), dtype=jnp.float32) * 0.02

    # One-time parameter prep (constant in the real model): transpose + bf16.
    w_prep = prepare_conv1x1_weight(w, dtype=jnp.bfloat16)

    out = conv2d_1x1(x, w_prep, b)
    jax.block_until_ready(out)
    assert out.shape == (N, Cout, H, W), out.shape

    # Tight check: same math in plain JAX (bf16-rounded x and weight, f32
    # accumulate) -- matches the in-kernel MXU numerics up to summation order.
    w2d_f32 = w.reshape(Cout, Cin)
    w2d_rounded = w2d_f32.astype(jnp.bfloat16).astype(jnp.float32)
    x_rounded = x.astype(jnp.bfloat16).astype(jnp.float32)
    ref_bf16 = (
        jnp.einsum("nchw,oc->nohw", x_rounded, w2d_rounded)
        + b.reshape(1, Cout, 1, 1)
    )
    assert jnp.allclose(out, ref_bf16, atol=1e-3, rtol=1e-3), \
        "mismatch vs bf16 reference"

    # Loose check vs. the exact-f32 PyTorch-equivalent reference; the only
    # difference is the deliberate bf16 rounding of the weight and of x.
    ref_f32 = jnp.einsum("nchw,oc->nohw", x, w2d_f32) + b.reshape(1, Cout, 1, 1)
    assert jnp.allclose(out, ref_f32, atol=2e-2, rtol=2e-2), \
        "mismatch vs f32 reference"

    print("KERNEL_OK")
</pallas_src>

<mosaic_0001>
module attributes {stable_mosaic.version = 11 : i64} {
  func.func @_conv1x1_kernel(%arg0: memref<1x1536xf32, #tpu.memory_space<vmem>>, %arg1: memref<1536x64xbf16, #tpu.memory_space<vmem>>, %arg2: memref<1x64xf32, #tpu.memory_space<vmem>>, %arg3: memref<1x64xf32, #tpu.memory_space<vmem>>) attributes {dimension_semantics = [], scalar_prefetch = 0 : i64, scratch_operands = 0 : i64, tpu.core_type = #tpu.core_type<tc>} {
    %c0 = arith.constant 0 : index
    %c0_0 = arith.constant 0 : index
    %0 = vector.load %arg0[%c0, %c0_0] : memref<1x1536xf32, #tpu.memory_space<vmem>>, vector<1x1536xf32>
    %1 = arith.truncf %0 : vector<1x1536xf32> to vector<1x1536xbf16>
    %c0_1 = arith.constant 0 : index
    %c0_2 = arith.constant 0 : index
    %2 = vector.load %arg1[%c0_1, %c0_2] : memref<1536x64xbf16, #tpu.memory_space<vmem>>, vector<1536x64xbf16>
    %cst = arith.constant dense<0.000000e+00> : vector<1x64xf32>
    %3 = tpu.matmul %1, %2, %cst {dimension_numbers = #tpu.dot_dimension_numbers<[1], [0], [0], [1], [0, 0, 1, 1], [], []>} : vector<1x1536xbf16>, vector<1536x64xbf16>, vector<1x64xf32> -> vector<1x64xf32>
    %c0_3 = arith.constant 0 : index
    %c0_4 = arith.constant 0 : index
    %4 = vector.load %arg2[%c0_3, %c0_4] : memref<1x64xf32, #tpu.memory_space<vmem>>, vector<1x64xf32>
    %5 = arith.addf %3, %4 : vector<1x64xf32>
    %c0_5 = arith.constant 0 : index
    %c0_6 = arith.constant 0 : index
    %6 = vector.load %arg3[%c0_5, %c0_6] : memref<1x64xf32, #tpu.memory_space<vmem>>, vector<1x64xf32>
    tpu.vector_store %arg3[%c0_5, %c0_6], %5 {strides = array<i32>} : memref<1x64xf32, #tpu.memory_space<vmem>>, vector<1x64xf32>,
    return
  }
}

</mosaic_0001>

<bundles_post_ra>
// kernel: tpu_custom_call.1
= control target key start
LH: loop header
LB: loop body
LE: loop exit
PB: predicated region body
PF: predicated region fallthrough
CT: control target
= control target key end

     0   :  { %v20_v18 = vlaneseq  ;;  %s1821_s0 = inlined_call_operand.vmem [shape: f32[1,1536], index: 0, kind: input, shape index: {}]   ;;  %s1822_s1 = inlined_call_operand.vmem [shape: bf16[1536,64], index: 1, kind: input, shape index: {}]   ;;  %s1823_s2 = inlined_call_operand.vmem [shape: f32[1,64], index: 2, kind: input, shape index: {}]   ;;  %s1824_s3 = inlined_call_operand.hbm [shape: f32[1,64], index: 3, kind: output, shape index: {}]  }
   0x1   :  { %v1346_v0 = vld [vmem:[%s1822_s1 + $0x78] sm:$0xff]   ;;  %v1350_v4 = vld [vmem:[%s1822_s1 + $0x70] sm:$0xff]   ;;  %v1354_v8 = vld [vmem:[%s1822_s1 + $0x68] sm:$0xff]  }
   0x2   :  { %v1347_v1 = vld [vmem:[%s1822_s1 + $0xf8] sm:$0xff]   ;;  %1213 = vmatprep.subr.bf16.mxu0 %v1346_v0  ;;  %v1351_v5 = vld [vmem:[%s1822_s1 + $0xf0] sm:$0xff]   ;;  %v1355_v9 = vld [vmem:[%s1822_s1 + $0xe8] sm:$0xff]   ;;  %v1551_v23 = vshrl.u32 %v20_v18, 7 }
   0x3   :  { %v1348_v2 = vld [vmem:[%s1822_s1 + $0x38] sm:$0xff]   ;;  %1235 = vmatprep.subr.bf16.mxu1 %v1347_v1  ;;  %v1352_v6 = vld [vmem:[%s1822_s1 + $0x30] sm:$0xff]   ;;  %v1356_v10 = vld [vmem:[%s1822_s1 + $0x28] sm:$0xff]  }
   0x4   :  { %v1349_v3 = vld [vmem:[%s1822_s1 + $0xb8] sm:$0xff]   ;;  %1214 = vmatpush3.bf16.msra.mxu0 %v1348_v2  ;;  %v1353_v7 = vld [vmem:[%s1822_s1 + $0xb0] sm:$0xff]   ;;  %v1357_v11 = vld [vmem:[%s1822_s1 + $0xa8] sm:$0xff]   ;;  %v26_v28 = vsub.s32 1, %v1551_v23  ;;  %v34_v30 = vsub.s32 3, %v1551_v23  ;;  %v22_v32 = vsub.s32 0, %v1551_v23 }
   0x5   :  { %1236 = vmatpush3.bf16.msra.mxu1 %v1349_v3  ;;  %1215 = vmatprep.subr.bf16.mxu0 %v1350_v4  ;;  %v1358_v12 = vld [vmem:[%s1822_s1 + $0x60] sm:$0xff]   ;;  %v1362_v16 = vld [vmem:[%s1822_s1 + $0x58] sm:$0xff]   ;;  %v1366_v21 = vld [vmem:[%s1822_s1 + $0x50] sm:$0xff]   ;;  %v30_v34 = vsub.s32 2, %v1551_v23  ;;  %v42_v36 = vsub.s32 5, %v1551_v23  ;;  %v50_v38 = vsub.s32 7, %v1551_v23 }
   0x6   :  { %1237 = vmatprep.subr.bf16.mxu1 %v1351_v5  ;;  %v1359_v13 = vld [vmem:[%s1822_s1 + $0xe0] sm:$0xff]   ;;  %v1363_v17 = vld [vmem:[%s1822_s1 + $0xd8] sm:$0xff]   ;;  %v1367_v22 = vld [vmem:[%s1822_s1 + $0xd0] sm:$0xff]  }
   0x7   :  { %v1360_v14 = vld [vmem:[%s1822_s1 + $0x20] sm:$0xff]   ;;  %v1364_v19 = vld [vmem:[%s1822_s1 + $0x18] sm:$0xff]   ;;  %v1368_v24 = vld [vmem:[%s1822_s1 + $0x10] sm:$0xff]  }
   0x8   :  { %1216 = vmatpush3.bf16.msra.mxu0 %v1352_v6  ;;  %v1361_v15 = vld [vmem:[%s1822_s1 + $0xa0] sm:$0xff]   ;;  %v1365_v20 = vld [vmem:[%s1822_s1 + $0x98] sm:$0xff]   ;;  %v1369_v25 = vld [vmem:[%s1822_s1 + $0x90] sm:$0xff]  }
   0x9   :  { %1238 = vmatpush3.bf16.msra.mxu1 %v1353_v7  ;;  %1217 = vmatprep.subr.bf16.mxu0 %v1354_v8  ;;  %v1370_v26 = vld [vmem:[%s1822_s1 + $0x48] sm:$0xff]   ;;  %v1374_v33 = vld [vmem:[%s1822_s1 + $0x40] sm:$0xff]   ;;  %v1378_v45 = vld [vmem:[%s1822_s1 + $0x178] sm:$0xff]  }
   0xa   :  { %1239 = vmatprep.subr.bf16.mxu1 %v1355_v9  ;;  %v1371_v27 = vld [vmem:[%s1822_s1 + $0xc8] sm:$0xff]   ;;  %v1375_v35 = vld [vmem:[%s1822_s1 + $0xc0] sm:$0xff]   ;;  %v1379_v46 = vld [vmem:[%s1822_s1 + $0x1f8] sm:$0xff]  }
   0xb   :  { %v1372_v29 = vld [vmem:[%s1822_s1 + $0x8] sm:$0xff]   ;;  %v1376_v37 = vld [vmem:[%s1822_s1] sm:$0xff]   ;;  %v1380_v53 = vld [vmem:[%s1822_s1 + $0x138] sm:$0xff]  }
   0xc   :  { %1218 = vmatpush3.bf16.msra.mxu0 %v1356_v10  ;;  %v1373_v31 = vld [vmem:[%s1822_s1 + $0x88] sm:$0xff]   ;;  %v1377_v39 = vld [vmem:[%s1822_s1 + $0x80] sm:$0xff]   ;;  %v1381_v54 = vld [vmem:[%s1822_s1 + $0x1b8] sm:$0xff]  }
   0xd   :  { %1240 = vmatpush3.bf16.msra.mxu1 %v1357_v11  ;;  %1219 = vmatprep.subr.bf16.mxu0 %v1358_v12  ;;  %v1592_v40 = vld [vmem:[%s1821_s0] sm:$0xff]  ;;  %v1382_v55 = vld [vmem:[%s1822_s1 + $0x170] sm:$0xff]   ;;  %v1386_v61 = vld [vmem:[%s1822_s1 + $0x168] sm:$0xff]  }
   0xe   :  { %1241 = vmatprep.subr.bf16.mxu1 %v1359_v13  ;;  %v27_v41 = vrot.slane %v1592_v40, %v26_v28  ;;  %v35_v42 = vrot.slane %v1592_v40, %v34_v30  ;;  %v23_v43 = vrot.slane %v1592_v40, %v22_v32  ;;  %v31_v44 = vrot.slane %v1592_v40, %v30_v34  ;;  %v1383_v58 = vld [vmem:[%s1822_s1 + $0x1f0] sm:$0xff]   ;;  %v1387_v62 = vld [vmem:[%s1822_s1 + $0x1e8] sm:$0xff]   ;;  %v1390_v1 = vld [vmem:[%s1822_s1 + $0x160] sm:$0xff]  }
   0xf   :  { %v43_v47 = vrot.slane %v1592_v40, %v42_v36  ;;  %v51_v48 = vrot.slane %v1592_v40, %v50_v38  ;;  %v1384_v59 = vld [vmem:[%s1822_s1 + $0x130] sm:$0xff]   ;;  %v1388_v63 = vld [vmem:[%s1822_s1 + $0x128] sm:$0xff]   ;;  %v1391_v2 = vld [vmem:[%s1822_s1 + $0x1e0] sm:$0xff]  }
  0x10   :  { %1220 = vmatpush3.bf16.msra.mxu0 %v1360_v14  ;;  %v81_v49 = vpack.c.bf16 %v27_v41, %v27_v41  ;;  %v83_v50 = vpack.c.bf16 %v35_v42, %v35_v42  ;;  %v80_v51 = vpack.c.bf16 %v23_v43, %v23_v43  ;;  %v82_v52 = vpack.c.bf16 %v31_v44, %v31_v44  ;;  %v1385_v60 = vld [vmem:[%s1822_s1 + $0x1b0] sm:$0xff]   ;;  %v1389_v0 = vld [vmem:[%s1822_s1 + $0x1a8] sm:$0xff]   ;;  %v1392_v3 = vld [vmem:[%s1822_s1 + $0x120] sm:$0xff]  }
  0x11   :  { %1242 = vmatpush3.bf16.msra.mxu1 %v1361_v15  ;;  %1221 = vmatprep.subr.bf16.mxu0 %v1362_v16  ;;  %v85_v56 = vpack.c.bf16 %v43_v47, %v43_v47  ;;  %v87_v57 = vpack.c.bf16 %v51_v48, %v51_v48  ;;  %v1393_v4 = vld [vmem:[%s1822_s1 + $0x1a0] sm:$0xff]   ;;  %v1394_v5 = vld [vmem:[%s1822_s1 + $0x158] sm:$0xff]   ;;  %v1398_v9 = vld [vmem:[%s1822_s1 + $0x150] sm:$0xff]   ;;  %v38_v14 = vsub.s32 4, %v1551_v23  ;;  %v46_v16 = vsub.s32 6, %v1551_v23 }
  0x12   :  { %1243 = vmatprep.subr.bf16.mxu1 %v1363_v17  ;;  %893 = vmatprep.mubr.bf16.mxu0 %v81_v49  ;;  %v1395_v6 = vld [vmem:[%s1822_s1 + $0x1d8] sm:$0xff]   ;;  %v1399_v10 = vld [vmem:[%s1822_s1 + $0x1d0] sm:$0xff]   ;;  %v1402_v13 = vld [vmem:[%s1822_s1 + $0x148] sm:$0xff]  }
  0x13   :  { %933 = vmatprep.mubr.bf16.mxu1 %v83_v50  ;;  %v1396_v7 = vld [vmem:[%s1822_s1 + $0x118] sm:$0xff]   ;;  %v1400_v11 = vld [vmem:[%s1822_s1 + $0x110] sm:$0xff]   ;;  %v1403_v15 = vld [vmem:[%s1822_s1 + $0x1c8] sm:$0xff]  }
  0x14   :  { %1222 = vmatpush3.bf16.msra.mxu0 %v1364_v19  ;;  %v1397_v8 = vld [vmem:[%s1822_s1 + $0x198] sm:$0xff]   ;;  %v1401_v12 = vld [vmem:[%s1822_s1 + $0x190] sm:$0xff]   ;;  %v1404_v17 = vld [vmem:[%s1822_s1 + $0x108] sm:$0xff]  }
  0x15   :  { %1244 = vmatpush3.bf16.msra.mxu1 %v1365_v20  ;;  %1223 = vmatprep.subr.bf16.mxu0 %v1366_v21  ;;  %v1405_v18 = vld [vmem:[%s1822_s1 + $0x188] sm:$0xff]   ;;  %v1406_v19 = vld [vmem:[%s1822_s1 + $0x140] sm:$0xff]   ;;  %v39_v21 = vrot.slane %v1592_v40, %v38_v14  ;;  %v1414_v36 = vld [vmem:[%s1822_s1 + $0x270] sm:$0xff]  }
  0x16   :  { %1245 = vmatprep.subr.bf16.mxu1 %v1367_v22  ;;  %v1407_v20 = vld [vmem:[%s1822_s1 + $0x1c0] sm:$0xff]   ;;  %v47_v22 = vrot.slane %v1592_v40, %v46_v16  ;;  %v1416_v38 = vld [vmem:[%s1822_s1 + $0x230] sm:$0xff]   ;;  %v1418_v40 = vld [vmem:[%s1822_s1 + $0x268] sm:$0xff]  }
  0x17   :  { %v1419_v41 = vld [vmem:[%s1822_s1 + $0x2e8] sm:$0xff]   ;;  %v1422_v44 = vld [vmem:[%s1822_s1 + $0x260] sm:$0xff]   ;;  %v1426_v48 = vld [vmem:[%s1822_s1 + $0x258] sm:$0xff]  }
  0x18   :  { %1224 = vmatpush3.bf16.msra.mxu0 %v1368_v24  ;;  %v1408_v24 = vld [vmem:[%s1822_s1 + $0x100] sm:$0xff]   ;;  %v1420_v42 = vld [vmem:[%s1822_s1 + $0x228] sm:$0xff]   ;;  %v1427_v49 = vld [vmem:[%s1822_s1 + $0x2d8] sm:$0xff]  }
  0x19   :  { %1246 = vmatpush3.bf16.msra.mxu1 %v1369_v25  ;;  %1225 = vmatprep.subr.bf16.mxu0 %v1370_v26  ;;  %v1409_v25 = vld [vmem:[%s1822_s1 + $0x180] sm:$0xff]   ;;  %v1410_v26 = vld [vmem:[%s1822_s1 + $0x278] sm:$0xff]   ;;  %v1421_v43 = vld [vmem:[%s1822_s1 + $0x2a8] sm:$0xff]  }
  0x1a   :  { %1247 = vmatprep.subr.bf16.mxu1 %v1371_v27  ;;  %v84_v27 = vpack.c.bf16 %v39_v21, %v39_v21  ;;  %v1425_v47 = vld [vmem:[%s1822_s1 + $0x2a0] sm:$0xff]   ;;  %v1428_v50 = vld [vmem:[%s1822_s1 + $0x218] sm:$0xff]  }
  0x1c   :  { %1226 = vmatpush3.bf16.msra.mxu0 %v1372_v29  ;;  %v86_v29 = vpack.c.bf16 %v47_v22, %v47_v22 }
  0x1d   :  { %1248 = vmatpush3.bf16.msra.mxu1 %v1373_v31  ;;  %1227 = vmatprep.subr.bf16.mxu0 %v1374_v33  ;;  %v1411_v31 = vld [vmem:[%s1822_s1 + $0x2f8] sm:$0xff]  }
  0x1e   :  { %1249 = vmatprep.subr.bf16.mxu1 %v1375_v35  ;;  %v1412_v33 = vld [vmem:[%s1822_s1 + $0x238] sm:$0xff]  }
  0x1f   :  { %v1413_v35 = vld [vmem:[%s1822_s1 + $0x2b8] sm:$0xff]  }
  0x20   :  { %1228 = vmatpush3.bf16.msra.mxu0 %v1376_v37  ;;  %v1415_v37 = vld [vmem:[%s1822_s1 + $0x2f0] sm:$0xff]  }
  0x21   :  { %1250 = vmatpush3.bf16.msra.mxu1 %v1377_v39  ;;  %1257 = vmatprep.subr.bf16.mxu0 %v1378_v45  ;;  %v1417_v39 = vld [vmem:[%s1822_s1 + $0x2b0] sm:$0xff]   ;;  %v1423_v45 = vld [vmem:[%s1822_s1 + $0x2e0] sm:$0xff]  }
  0x22   :  { %1279 = vmatprep.subr.bf16.mxu1 %v1379_v46  ;;  %v1424_v46 = vld [vmem:[%s1822_s1 + $0x220] sm:$0xff]  }
  0x23   :  { %894 = vmatmul.mubr.bf16.vlgmr.msra.gmra.mxu0 %v80_v51  ;;  %v1429_v51 = vld [vmem:[%s1822_s1 + $0x298] sm:$0xff]  }
  0x24   :  { %934 = vmatmul.mubr.bf16.vlgmr.msra.gmra.mxu1 %v82_v52  ;;  %1258 = vmatpush3.bf16.msra.mxu0 %v1380_v53  ;;  %v1430_v52 = vld [vmem:[%s1822_s1 + $0x250] sm:$0xff]  }
  0x25   :  { %1280 = vmatpush3.bf16.msra.mxu1 %v1381_v54  ;;  %1259 = vmatprep.subr.bf16.mxu0 %v1382_v55  ;;  %v1431_v53 = vld [vmem:[%s1822_s1 + $0x2d0] sm:$0xff]  }
  0x26   :  { %1281 = vmatprep.subr.bf16.mxu1 %v1383_v58  ;;  %973 = vmatprep.mubr.bf16.mxu0 %v85_v56  ;;  %v1432_v54 = vld [vmem:[%s1822_s1 + $0x210] sm:$0xff]   ;;  %v1434_v56 = vld [vmem:[%s1822_s1 + $0x248] sm:$0xff]  }
  0x27   :  { %1013 = vmatprep.mubr.bf16.mxu1 %v87_v57  ;;  %v1433_v55 = vld [vmem:[%s1822_s1 + $0x290] sm:$0xff]   ;;  %v1435_v57 = vld [vmem:[%s1822_s1 + $0x2c8] sm:$0xff]  }
  0x28   :  { %1260 = vmatpush3.bf16.msra.mxu0 %v1384_v59  ;;  %v1436_v58 = vld [vmem:[%s1822_s1 + $0x208] sm:$0xff]  }
  0x29   :  { %1282 = vmatpush3.bf16.msra.mxu1 %v1385_v60  ;;  %1261 = vmatprep.subr.bf16.mxu0 %v1386_v61  ;;  %v1437_v59 = vld [vmem:[%s1822_s1 + $0x288] sm:$0xff]   ;;  %v1438_v60 = vld [vmem:[%s1822_s1 + $0x240] sm:$0xff]  }
  0x2a   :  { %1283 = vmatprep.subr.bf16.mxu1 %v1387_v62  ;;  %v1439_v61 = vld [vmem:[%s1822_s1 + $0x2c0] sm:$0xff]  }
  0x2b   :  { %v1440_v62 = vld [vmem:[%s1822_s1 + $0x200] sm:$0xff]  }
  0x2c   :  { %1262 = vmatpush3.bf16.msra.mxu0 %v1388_v63  ;;  %v1441_v63 = vld [vmem:[%s1822_s1 + $0x280] sm:$0xff]  }
  0x2d   :  { %1284 = vmatpush3.bf16.msra.mxu1 %v1389_v0  ;;  %1263 = vmatprep.subr.bf16.mxu0 %v1390_v1  ;;  %v17_v0 = vld [vmem:[%s1821_s0 + $0x8] sm:$0xf] }
  0x2e   :  { %1285 = vmatprep.subr.bf16.mxu1 %v1391_v2 }
  0x30   :  { %1264 = vmatpush3.bf16.msra.mxu0 %v1392_v3 }
  0x31   :  { %1286 = vmatpush3.bf16.msra.mxu1 %v1393_v4  ;;  %1265 = vmatprep.subr.bf16.mxu0 %v1394_v5 }
  0x32   :  { %1287 = vmatprep.subr.bf16.mxu1 %v1395_v6 }
  0x34   :  { %1266 = vmatpush3.bf16.msra.mxu0 %v1396_v7 }
  0x35   :  { %1288 = vmatpush3.bf16.msra.mxu1 %v1397_v8  ;;  %1267 = vmatprep.subr.bf16.mxu0 %v1398_v9 }
  0x36   :  { %1289 = vmatprep.subr.bf16.mxu1 %v1399_v10 }
  0x38   :  { %1268 = vmatpush3.bf16.msra.mxu0 %v1400_v11 }
  0x39   :  { %1290 = vmatpush3.bf16.msra.mxu1 %v1401_v12  ;;  %1269 = vmatprep.subr.bf16.mxu0 %v1402_v13 }
  0x3a   :  { %1291 = vmatprep.subr.bf16.mxu1 %v1403_v15 }
  0x3c   :  { %1270 = vmatpush3.bf16.msra.mxu0 %v1404_v17 }
  0x3d   :  { %1292 = vmatpush3.bf16.msra.mxu1 %v1405_v18  ;;  %1271 = vmatprep.subr.bf16.mxu0 %v1406_v19 }
  0x3e   :  { %1293 = vmatprep.subr.bf16.mxu1 %v1407_v20 }
  0x40   :  { %1272 = vmatpush3.bf16.msra.mxu0 %v1408_v24 }
  0x41   :  { %1294 = vmatpush3.bf16.msra.mxu1 %v1409_v25  ;;  %1301 = vmatprep.subr.bf16.mxu0 %v1410_v26 }
  0x42   :  { %1323 = vmatprep.subr.bf16.mxu1 %v1411_v31 }
  0x43   :  { %974 = vmatmul.mubr.bf16.vlgmr.msra.gmra.mxu0 %v84_v27 }
  0x44   :  { %1014 = vmatmul.mubr.bf16.vlgmr.msra.gmra.mxu1 %v86_v29  ;;  %1302 = vmatpush3.bf16.msra.mxu0 %v1412_v33 }
  0x45   :  { %1324 = vmatpush3.bf16.msra.mxu1 %v1413_v35  ;;  %1303 = vmatprep.subr.bf16.mxu0 %v1414_v36 }
  0x46   :  { %1325 = vmatprep.subr.bf16.mxu1 %v1415_v37 }
  0x48   :  { %1304 = vmatpush3.bf16.msra.mxu0 %v1416_v38 }
  0x49   :  { %1326 = vmatpush3.bf16.msra.mxu1 %v1417_v39  ;;  %1305 = vmatprep.subr.bf16.mxu0 %v1418_v40 }
  0x4a   :  { %1327 = vmatprep.subr.bf16.mxu1 %v1419_v41 }
  0x4c   :  { %1306 = vmatpush3.bf16.msra.mxu0 %v1420_v42 }
  0x4d   :  { %1328 = vmatpush3.bf16.msra.mxu1 %v1421_v43  ;;  %1307 = vmatprep.subr.bf16.mxu0 %v1422_v44 }
  0x4e   :  { %1329 = vmatprep.subr.bf16.mxu1 %v1423_v45 }
  0x50   :  { %1308 = vmatpush3.bf16.msra.mxu0 %v1424_v46 }
  0x51   :  { %1330 = vmatpush3.bf16.msra.mxu1 %v1425_v47  ;;  %1309 = vmatprep.subr.bf16.mxu0 %v1426_v48 }
  0x52   :  { %1331 = vmatprep.subr.bf16.mxu1 %v1427_v49 }
  0x54   :  { %1310 = vmatpush3.bf16.msra.mxu0 %v1428_v50 }
  0x55   :  { %1332 = vmatpush3.bf16.msra.mxu1 %v1429_v51  ;;  %1311 = vmatprep.subr.bf16.mxu0 %v1430_v52 }
  0x56   :  { %1333 = vmatprep.subr.bf16.mxu1 %v1431_v53 }
  0x58   :  { %1312 = vmatpush3.bf16.msra.mxu0 %v1432_v54 }
  0x59   :  { %1334 = vmatpush3.bf16.msra.mxu1 %v1433_v55  ;;  %1313 = vmatprep.subr.bf16.mxu0 %v1434_v56 }
  0x5a   :  { %1335 = vmatprep.subr.bf16.mxu1 %v1435_v57 }
  0x5c   :  { %1314 = vmatpush3.bf16.msra.mxu0 %v1436_v58 }
  0x5d   :  { %1336 = vmatpush3.bf16.msra.mxu1 %v1437_v59  ;;  %1315 = vmatprep.subr.bf16.mxu0 %v1438_v60 }
  0x5e   :  { %1337 = vmatprep.subr.bf16.mxu1 %v1439_v61 }
  0x5f   :  { %8 = vsyncpa [#allocation3], 0  ;;  %v59_v1 = vrot.slane %v17_v0, %v26_v28  ;;  %v67_v2 = vrot.slane %v17_v0, %v34_v30  ;;  %v55_v3 = vrot.slane %v17_v0, %v22_v32  ;;  %v63_v4 = vrot.slane %v17_v0, %v30_v34  ;;  %v284_v21 = vld [vmem:[%s1823_s2] sm:$0x1]  ;;  %s1464_s19 = smov [#allocation2]  }
  0x60   :  { %1316 = vmatpush3.bf16.msra.mxu0 %v1440_v62  ;;  %s1109_s20 = sshll.u32 %s1464_s19, 4  ;;  %vm1101_vm0 = vcmask 516096   ;;  %s1110_s20 = int_to_ptr.vmem [resolvable:$true] %s1109_s20 }
  0x61   :  { %1338 = vmatpush3.bf16.msra.mxu1 %v1441_v63  ;;  %v89_v5 = vpack.c.bf16 %v59_v1, %v59_v1  ;;  %v91_v6 = vpack.c.bf16 %v67_v2, %v67_v2  ;;  %v88_v7 = vpack.c.bf16 %v55_v3, %v55_v3  ;;  %v90_v8 = vpack.c.bf16 %v63_v4, %v63_v4  ;;  %s1442_s2 = scalar_lea.vmem %s1110_s20, 16  ;;  %s1446_s21 = scalar_lea.vmem %s1110_s20, 32 }
  0x62   :  { %p1443_p0 = scmp.ne.s32.totalorder %s1110_s20, %s1442_s2  ;;  %p1447_p1 = scmp.lt.s32.totalorder %s1110_s20, %s1110_s20 }
  0x63   :  { %1053 = vmatprep.mubr.bf16.mxu0 %v89_v5  ;;  %1093 = vmatprep.mubr.bf16.mxu1 %v91_v6  ;;  %p1448_p2 = scmp.lt.s32.totalorder %s1446_s21, %s1442_s2 }
  0x64   :  { %1054 = vmatmul.mubr.bf16.vlgmr.msra.gmra.mxu0 %v88_v7  ;;  %1094 = vmatmul.mubr.bf16.vlgmr.msra.gmra.mxu1 %v90_v8 }
  0x65   :  { %p1449_p3 = por %p1448_p2, %p1447_p1 }
  0x67   :  { %p1450_p4 = pnand %p1449_p3, %p1443_p0 }
  0xe3   :  { %v1229_v28 = vpop.f32.mrf.mxu0 }
  0xe4   :  { %v1251_v9 = vpop.f32.mrf.mxu1 }
  0xe5   :  { %v1230_v10 = vpop.f32.mrf.mxu0 }
  0xe6   :  { %v1252_v30 = vpop.f32.mrf.mxu1  ;;  %v1231_v20 = vadd.f32 %v1230_v10, %v1229_v28 }
  0xe7   :  { %v1232_v11 = vpop.f32.mrf.mxu0  ;;  %v1253_v24 = vadd.f32 %v1252_v30, %v1251_v9 }
  0xe8   :  { %v1254_v12 = vpop.f32.mrf.mxu1  ;;  %v896_v22 = vadd.f32 %v1231_v20, %v284_v21 }
  0xe9   :  { %v1233_v32 = vpop.f32.mrf.mxu0 }
  0xea   :  { %v1255_v13 = vpop.f32.mrf.mxu1  ;;  %v936_v26 = vadd.f32 %v1253_v24, %v896_v22 }
 0x103   :  { %v1273_v23 = vpop.f32.mrf.mxu0 }
 0x104   :  { %v1295_v34 = vpop.f32.mrf.mxu1 }
 0x105   :  { %v1274_v14 = vpop.f32.mrf.mxu0 }
 0x106   :  { %v1296_v15 = vpop.f32.mrf.mxu1  ;;  %v1275_v25 = vadd.f32 %v1274_v14, %v1273_v23 }
 0x107   :  { %v1276_v16 = vpop.f32.mrf.mxu0  ;;  %v1297_v29 = vadd.f32 %v1296_v15, %v1295_v34 }
 0x108   :  { %v1298_v17 = vpop.f32.mrf.mxu1  ;;  %v976_v27 = vadd.f32 %v1275_v25, %v936_v26 }
 0x109   :  { %v1277_v18 = vpop.f32.mrf.mxu0 }
 0x10a   :  { %v1299_v19 = vpop.f32.mrf.mxu1  ;;  %v1016_v37 = vadd.f32 %v1297_v29, %v976_v27 }
 0x124   :  { %v1317_v31 = vpop.f32.mrf.mxu0  ;;  %v1339_v33 = vpop.f32.mrf.mxu1 }
 0x126   :  { %v1318_v35 = vpop.f32.mrf.mxu0  ;;  %v1340_v36 = vpop.f32.mrf.mxu1 }
 0x127   :  { %v1319_v38 = vadd.f32 %v1318_v35, %v1317_v31  ;;  %v1341_v42 = vadd.f32 %v1340_v36, %v1339_v33 }
 0x128   :  { %v1320_v39 = vpop.f32.mrf.mxu0  ;;  %v1342_v40 = vpop.f32.mrf.mxu1 }
 0x129   :  { %v1056_v41 = vadd.f32 %v1319_v38, %v1016_v37 }
 0x12a   :  { %v1321_v43 = vpop.f32.mrf.mxu0  ;;  %v1343_v44 = vpop.f32.mrf.mxu1 }
 0x12b   :  { %v1096_v45 = vadd.f32 %v1341_v42, %v1056_v41 }
 0x12d   :  { %1102 = vst.msk [vmem:[#allocation2] sm:$0x1] %vm1101_vm0, %v1096_v45 }
 0x12e   :  { %1453 = shalt.err (!%p1450_p4)
}
 0x12f   :  { %1112 = dma.vmem_to_hbm [thread:$0]  %s1110_s20, 16, %s1824_s3, [#allocation3]  }
 0x130   :  { %1462 = dma.done.wait [#allocation3], 16  }
 0x131   :  { %1463 = vsyncadd [#allocation3], 4294967280 }
 0x132   :  { %1116 = vsyncpa [#allocation3], 1 }

</bundles_post_ra>
